<compile_context>
chip_gen: v5e
topology: v5e:2x2
jax: 0.10.0
libtpu: 0.0.40
codegen_flags: <defaults>
</compile_context>

<pallas_src>
import functools

import jax
import jax.numpy as jnp
from jax.experimental import pallas as pl
from jax.experimental.pallas import tpu as pltpu

# ------------------------- config (small, deterministic) -------------------------
D_CHAN = 32          # conf.D_chan
D_KERNEL = 7         # conf.D_kernel_size
D_N_LAYERS = 4       # conf.D_n_layers  -> 2 conv-bn-relu feature units
BN_EPS = 1e-5


def _round_up(v, m):
    return -(-v // m) * m


# ------------------------------- parameter setup ---------------------------------
def _spectral_normalize(w):
    # nn.utils.spectral_norm divides the weight by its top singular value
    # (weight viewed as (out_channels, -1)); we use the exact SVD value here.
    w2d = w.reshape(w.shape[0], -1)
    sigma = jnp.linalg.svd(w2d, compute_uv=False)[0]
    return w / sigma


def init_params(key):
    n_feat = D_N_LAYERS - 2
    C, K = D_CHAN, D_KERNEL
    ks = jax.random.split(key, 3 + n_feat)

    w1 = _spectral_normalize(0.1 * jax.random.normal(ks[0], (C, 3, K, K), jnp.float32))
    b1 = 0.01 * jax.random.normal(ks[1], (C,), jnp.float32)

    wf, bf, gam, bet = [], [], [], []
    for l in range(n_feat):
        kk = jax.random.split(ks[2 + l], 4)
        w = _spectral_normalize(0.1 * jax.random.normal(kk[0], (C, C, 1, 1), jnp.float32))
        wf.append(w.reshape(C, C))                                    # (Cout, Cin): y = W @ x
        bf.append(0.01 * jax.random.normal(kk[1], (C,), jnp.float32))
        gam.append(1.0 + 0.05 * jax.random.normal(kk[2], (C,), jnp.float32))
        bet.append(0.05 * jax.random.normal(kk[3], (C,), jnp.float32))

    ko = jax.random.split(ks[-1], 2)
    wo = _spectral_normalize(0.1 * jax.random.normal(ko[0], (1, C, 1, 1), jnp.float32))
    bo = 0.01 * jax.random.normal(ko[1], (1,), jnp.float32)

    return dict(
        # bf16 matmul operands (2x MXU throughput, half the DMA bytes)
        w1=w1.reshape(C, 3 * K * K).astype(jnp.bfloat16),             # (C, Cin*K*K)
        b1=b1.reshape(C, 1),                                          # per-channel column
        wf=jnp.stack(wf).astype(jnp.bfloat16),                        # (L, Cout, Cin)
        bf=jnp.stack(bf).reshape(n_feat, C, 1),
        gamma=jnp.stack(gam).reshape(n_feat, C, 1),
        beta=jnp.stack(bet).reshape(n_feat, C, 1),
        wo=wo.reshape(1, C).astype(jnp.bfloat16),                     # (1, C)
        bo=bo.reshape(1, 1),
    )


# ---------------------------------- Pallas kernel ---------------------------------
def _disc_kernel(*refs, n_feat, inv_n, has_pad):
    if has_pad:
        (pat_ref, mask_ref, w1_ref, b1_ref, wf_ref, bf_ref,
         gam_ref, bet_ref, wo_ref, bo_ref, out_ref) = refs
    else:
        (pat_ref, w1_ref, b1_ref, wf_ref, bf_ref,
         gam_ref, bet_ref, wo_ref, bo_ref, out_ref) = refs
        mask_ref = None

    # first_layer: KxK valid conv realised as (C, Cin*K*K)bf16 @ (Cin*K*K, Mpad)bf16
    # on the MXU with f32 accumulation; activations are (C, Mpad) lane-dense.
    x = jnp.dot(w1_ref[...], pat_ref[...],
                preferred_element_type=jnp.float32) + b1_ref[...]

    mask = mask_ref[...] if has_pad else None                         # (1, Mpad)

    # feature_block: [1x1 conv + BatchNorm2d (training-mode batch stats) + ReLU] * n_feat
    for l in range(n_feat):
        y = jnp.dot(wf_ref[l], x.astype(jnp.bfloat16),
                    preferred_element_type=jnp.float32) + bf_ref[l]   # (C, Mpad) f32
        if has_pad:  # static branch: mask only when padded lanes exist
            mean = jnp.sum(y * mask, axis=-1, keepdims=True) * inv_n        # (C, 1)
            d = y - mean
            var = jnp.sum((d * d) * mask, axis=-1, keepdims=True) * inv_n   # biased var
        else:
            mean = jnp.sum(y, axis=-1, keepdims=True) * inv_n
            d = y - mean
            var = jnp.sum(d * d, axis=-1, keepdims=True) * inv_n
        y = d * jax.lax.rsqrt(var + BN_EPS) * gam_ref[l] + bet_ref[l]
        x = jnp.maximum(y, 0.0)

    # final_layer: 1x1 conv to 1 channel + Sigmoid, lane-dense (1, Mpad) store
    z = jnp.dot(wo_ref[...], x.astype(jnp.bfloat16),
                preferred_element_type=jnp.float32) + bo_ref[...]
    out_ref[...] = jax.nn.sigmoid(z)


# ------------------------------------ wrapper --------------------------------------
def discriminator_forward(x_nchw, params):
    N, Cin, H, W = x_nchw.shape
    K = D_KERNEL
    C = params["w1"].shape[0]
    Ho, Wo = H - K + 1, W - K + 1
    M = N * Ho * Wo
    CKK = Cin * K * K
    n_feat = params["wf"].shape[0]

    # Fused im2col (single conv-based patch gather, no 49x sliced HBM copy).
    # Feature ordering of the output channel dim is (ci, ky, kx) -> matches the
    # PyTorch (Cout, Cin, Kh, Kw) weight flattening in init_params.
    pats = jax.lax.conv_general_dilated_patches(
        x_nchw.astype(jnp.bfloat16), filter_shape=(K, K), window_strides=(1, 1),
        padding="VALID", dimension_numbers=("NCHW", "OIHW", "NCHW"))
    pats_t = pats.transpose(1, 0, 2, 3).reshape(CKK, M)       # transposed: pixels on lanes

    Mpad = _round_up(M, 128)                                  # lane-dense tiles + output
    has_pad = Mpad != M
    if has_pad:
        pats_t = jnp.pad(pats_t, ((0, 0), (0, Mpad - M)))
        mask = (jnp.arange(Mpad) < M).astype(jnp.float32).reshape(1, Mpad)

    kernel = functools.partial(_disc_kernel, n_feat=n_feat,
                               inv_n=1.0 / float(M), has_pad=has_pad)

    inputs = [pats_t] + ([mask] if has_pad else []) + [
        params["w1"], params["b1"], params["wf"], params["bf"],
        params["gamma"], params["beta"], params["wo"], params["bo"]]

    vmem = pl.BlockSpec(memory_space=pltpu.MemorySpace.VMEM)

    # Advisory scheduling / memory hints.
    flops = 2 * M * (CKK * C + n_feat * C * C + C)
    bytes_accessed = int(sum(int(a.size) * a.dtype.itemsize for a in inputs) + Mpad * 4)
    cost = pl.CostEstimate(flops=int(flops), transcendentals=int(M),
                           bytes_accessed=bytes_accessed)

    ckk_pad = _round_up(CKK, 16)                              # bf16 sublane packing
    footprint = (ckk_pad * Mpad * 2                           # patches (bf16)
                 + 6 * C * Mpad * 4                           # live f32 activations
                 + 8 * Mpad * 4                               # mask + output rows
                 + (1 << 20))                                 # params + slack
    vmem_limit = int(min(max(3 * footprint, 16 << 20), 48 << 20))

    # TODO(synk): for production-size crops/batches (M >> 1e4) add an M-tiled grid
    # ("parallel" for v7x megacore) with a two-pass BatchNorm (stats pass, then
    # normalize+activate pass); at these sizes the whole problem fits one VMEM block.
    out_row = pl.pallas_call(
        kernel,
        out_shape=jax.ShapeDtypeStruct((1, Mpad), jnp.float32),
        in_specs=[vmem] * len(inputs),
        out_specs=vmem,
        compiler_params=pltpu.CompilerParams(vmem_limit_bytes=vmem_limit),
        cost_estimate=cost,
    )(*inputs)

    # back to NCHW (N, 1, Ho, Wo)
    out = out_row[0, :M].reshape(N, Ho, Wo)[:, None, :, :]
    return out


# ------------------------------------- main -----------------------------------------
if __name__ == "__main__":
    key = jax.random.PRNGKey(0)
    pkey, xkey = jax.random.split(key)

    params = init_params(pkey)

    # small deterministic input consistent with the module: NCHW, 3 input channels
    x = jax.random.normal(xkey, (2, 3, 16, 16), jnp.float32)

    out = discriminator_forward(x, params)
    out = jax.block_until_ready(out)

    # forward_shave = input_crop_size - output_spatial = D_KERNEL - 1 (side computation)
    assert out.shape == (2, 1, 16 - D_KERNEL + 1, 16 - D_KERNEL + 1), out.shape
    assert bool(jnp.all(jnp.isfinite(out)))
    assert bool(jnp.all((out > 0.0) & (out < 1.0)))   # sigmoid output range

    print("KERNEL_OK")
</pallas_src>

<mosaic_0001>
module attributes {stable_mosaic.version = 11 : i64} {
  func.func @_disc_kernel(%arg0: memref<147x256xbf16, #tpu.memory_space<vmem>>, %arg1: memref<1x256xf32, #tpu.memory_space<vmem>>, %arg2: memref<32x147xbf16, #tpu.memory_space<vmem>>, %arg3: memref<32x1xf32, #tpu.memory_space<vmem>>, %arg4: memref<2x32x32xbf16, #tpu.memory_space<vmem>>, %arg5: memref<2x32x1xf32, #tpu.memory_space<vmem>>, %arg6: memref<2x32x1xf32, #tpu.memory_space<vmem>>, %arg7: memref<2x32x1xf32, #tpu.memory_space<vmem>>, %arg8: memref<1x32xbf16, #tpu.memory_space<vmem>>, %arg9: memref<1x1xf32, #tpu.memory_space<vmem>>, %arg10: memref<1x256xf32, #tpu.memory_space<vmem>>) attributes {dimension_semantics = [], scalar_prefetch = 0 : i64, scratch_operands = 0 : i64, tpu.core_type = #tpu.core_type<tc>} {
    %c0 = arith.constant 0 : index
    %c0_0 = arith.constant 0 : index
    %0 = vector.load %arg2[%c0, %c0_0] : memref<32x147xbf16, #tpu.memory_space<vmem>>, vector<32x147xbf16>
    %c0_1 = arith.constant 0 : index
    %c0_2 = arith.constant 0 : index
    %1 = vector.load %arg0[%c0_1, %c0_2] : memref<147x256xbf16, #tpu.memory_space<vmem>>, vector<147x256xbf16>
    %cst = arith.constant dense<0.000000e+00> : vector<32x256xf32>
    %2 = tpu.matmul %0, %1, %cst {dimension_numbers = #tpu.dot_dimension_numbers<[1], [0], [0], [1], [0, 0, 1, 1], [], []>} : vector<32x147xbf16>, vector<147x256xbf16>, vector<32x256xf32> -> vector<32x256xf32>
    %c0_3 = arith.constant 0 : index
    %c0_4 = arith.constant 0 : index
    %3 = vector.load %arg3[%c0_3, %c0_4] : memref<32x1xf32, #tpu.memory_space<vmem>>, vector<32x1xf32>
    %4 = vector.broadcast %3 : vector<32x1xf32> to vector<32x256xf32>
    %5 = arith.addf %2, %4 : vector<32x256xf32>
    %c0_5 = arith.constant 0 : index
    %c0_6 = arith.constant 0 : index
    %6 = vector.load %arg1[%c0_5, %c0_6] : memref<1x256xf32, #tpu.memory_space<vmem>>, vector<1x256xf32>
    %c0_7 = arith.constant 0 : index
    %c0_8 = arith.constant 0 : index
    %c0_9 = arith.constant 0 : index
    %7 = vector.load %arg4[%c0_7, %c0_8, %c0_9] : memref<2x32x32xbf16, #tpu.memory_space<vmem>>, vector<1x32x32xbf16>
    %8 = vector.shape_cast %7 : vector<1x32x32xbf16> to vector<32x32xbf16>
    %9 = arith.truncf %5 : vector<32x256xf32> to vector<32x256xbf16>
    %cst_10 = arith.constant dense<0.000000e+00> : vector<32x256xf32>
    %10 = tpu.matmul %8, %9, %cst_10 {dimension_numbers = #tpu.dot_dimension_numbers<[1], [0], [0], [1], [0, 0, 1, 1], [], []>} : vector<32x32xbf16>, vector<32x256xbf16>, vector<32x256xf32> -> vector<32x256xf32>
    %c0_11 = arith.constant 0 : index
    %c0_12 = arith.constant 0 : index
    %c0_13 = arith.constant 0 : index
    %11 = vector.load %arg5[%c0_11, %c0_12, %c0_13] : memref<2x32x1xf32, #tpu.memory_space<vmem>>, vector<1x32x1xf32>
    %12 = vector.shape_cast %11 : vector<1x32x1xf32> to vector<32x1xf32>
    %13 = vector.broadcast %12 : vector<32x1xf32> to vector<32x256xf32>
    %14 = arith.addf %10, %13 : vector<32x256xf32>
    %15 = vector.broadcast %6 : vector<1x256xf32> to vector<32x256xf32>
    %16 = arith.mulf %14, %15 : vector<32x256xf32>
    %cst_14 = arith.constant dense<0.000000e+00> : vector<32xf32>
    %17 = vector.multi_reduction <add>, %16, %cst_14 [1] : vector<32x256xf32> to vector<32xf32>
    %18 = vector.shape_cast %17 : vector<32xf32> to vector<32x1xf32>
    %cst_15 = arith.constant 5.000000e-03 : f32
    %19 = vector.broadcast %cst_15 : f32 to vector<32x1xf32>
    %20 = arith.mulf %18, %19 : vector<32x1xf32>
    %21 = vector.broadcast %20 : vector<32x1xf32> to vector<32x256xf32>
    %22 = arith.subf %14, %21 : vector<32x256xf32>
    %23 = arith.mulf %22, %22 : vector<32x256xf32>
    %24 = vector.broadcast %6 : vector<1x256xf32> to vector<32x256xf32>
    %25 = arith.mulf %23, %24 : vector<32x256xf32>
    %cst_16 = arith.constant dense<0.000000e+00> : vector<32xf32>
    %26 = vector.multi_reduction <add>, %25, %cst_16 [1] : vector<32x256xf32> to vector<32xf32>
    %27 = vector.shape_cast %26 : vector<32xf32> to vector<32x1xf32>
    %cst_17 = arith.constant 5.000000e-03 : f32
    %28 = vector.broadcast %cst_17 : f32 to vector<32x1xf32>
    %29 = arith.mulf %27, %28 : vector<32x1xf32>
    %cst_18 = arith.constant 9.99999974E-6 : f32
    %30 = vector.broadcast %cst_18 : f32 to vector<32x1xf32>
    %31 = arith.addf %29, %30 : vector<32x1xf32>
    %32 = math.rsqrt %31 : vector<32x1xf32>
    %33 = vector.broadcast %32 : vector<32x1xf32> to vector<32x256xf32>
    %34 = arith.mulf %22, %33 : vector<32x256xf32>
    %c0_19 = arith.constant 0 : index
    %c0_20 = arith.constant 0 : index
    %c0_21 = arith.constant 0 : index
    %35 = vector.load %arg6[%c0_19, %c0_20, %c0_21] : memref<2x32x1xf32, #tpu.memory_space<vmem>>, vector<1x32x1xf32>
    %36 = vector.shape_cast %35 : vector<1x32x1xf32> to vector<32x1xf32>
    %37 = vector.broadcast %36 : vector<32x1xf32> to vector<32x256xf32>
    %38 = arith.mulf %34, %37 : vector<32x256xf32>
    %c0_22 = arith.constant 0 : index
    %c0_23 = arith.constant 0 : index
    %c0_24 = arith.constant 0 : index
    %39 = vector.load %arg7[%c0_22, %c0_23, %c0_24] : memref<2x32x1xf32, #tpu.memory_space<vmem>>, vector<1x32x1xf32>
    %40 = vector.shape_cast %39 : vector<1x32x1xf32> to vector<32x1xf32>
    %41 = vector.broadcast %40 : vector<32x1xf32> to vector<32x256xf32>
    %42 = arith.addf %38, %41 : vector<32x256xf32>
    %cst_25 = arith.constant 0.000000e+00 : f32
    %43 = vector.broadcast %cst_25 : f32 to vector<32x256xf32>
    %44 = arith.maximumf %42, %43 : vector<32x256xf32>
    %c1 = arith.constant 1 : index
    %c0_26 = arith.constant 0 : index
    %c0_27 = arith.constant 0 : index
    %45 = vector.load %arg4[%c1, %c0_26, %c0_27] : memref<2x32x32xbf16, #tpu.memory_space<vmem>>, vector<1x32x32xbf16>
    %46 = vector.shape_cast %45 : vector<1x32x32xbf16> to vector<32x32xbf16>
    %47 = arith.truncf %44 : vector<32x256xf32> to vector<32x256xbf16>
    %cst_28 = arith.constant dense<0.000000e+00> : vector<32x256xf32>
    %48 = tpu.matmul %46, %47, %cst_28 {dimension_numbers = #tpu.dot_dimension_numbers<[1], [0], [0], [1], [0, 0, 1, 1], [], []>} : vector<32x32xbf16>, vector<32x256xbf16>, vector<32x256xf32> -> vector<32x256xf32>
    %c1_29 = arith.constant 1 : index
    %c0_30 = arith.constant 0 : index
    %c0_31 = arith.constant 0 : index
    %49 = vector.load %arg5[%c1_29, %c0_30, %c0_31] : memref<2x32x1xf32, #tpu.memory_space<vmem>>, vector<1x32x1xf32>
    %50 = vector.shape_cast %49 : vector<1x32x1xf32> to vector<32x1xf32>
    %51 = vector.broadcast %50 : vector<32x1xf32> to vector<32x256xf32>
    %52 = arith.addf %48, %51 : vector<32x256xf32>
    %53 = vector.broadcast %6 : vector<1x256xf32> to vector<32x256xf32>
    %54 = arith.mulf %52, %53 : vector<32x256xf32>
    %cst_32 = arith.constant dense<0.000000e+00> : vector<32xf32>
    %55 = vector.multi_reduction <add>, %54, %cst_32 [1] : vector<32x256xf32> to vector<32xf32>
    %56 = vector.shape_cast %55 : vector<32xf32> to vector<32x1xf32>
    %cst_33 = arith.constant 5.000000e-03 : f32
    %57 = vector.broadcast %cst_33 : f32 to vector<32x1xf32>
    %58 = arith.mulf %56, %57 : vector<32x1xf32>
    %59 = vector.broadcast %58 : vector<32x1xf32> to vector<32x256xf32>
    %60 = arith.subf %52, %59 : vector<32x256xf32>
    %61 = arith.mulf %60, %60 : vector<32x256xf32>
    %62 = vector.broadcast %6 : vector<1x256xf32> to vector<32x256xf32>
    %63 = arith.mulf %61, %62 : vector<32x256xf32>
    %cst_34 = arith.constant dense<0.000000e+00> : vector<32xf32>
    %64 = vector.multi_reduction <add>, %63, %cst_34 [1] : vector<32x256xf32> to vector<32xf32>
    %65 = vector.shape_cast %64 : vector<32xf32> to vector<32x1xf32>
    %cst_35 = arith.constant 5.000000e-03 : f32
    %66 = vector.broadcast %cst_35 : f32 to vector<32x1xf32>
    %67 = arith.mulf %65, %66 : vector<32x1xf32>
    %cst_36 = arith.constant 9.99999974E-6 : f32
    %68 = vector.broadcast %cst_36 : f32 to vector<32x1xf32>
    %69 = arith.addf %67, %68 : vector<32x1xf32>
    %70 = math.rsqrt %69 : vector<32x1xf32>
    %71 = vector.broadcast %70 : vector<32x1xf32> to vector<32x256xf32>
    %72 = arith.mulf %60, %71 : vector<32x256xf32>
    %c1_37 = arith.constant 1 : index
    %c0_38 = arith.constant 0 : index
    %c0_39 = arith.constant 0 : index
    %73 = vector.load %arg6[%c1_37, %c0_38, %c0_39] : memref<2x32x1xf32, #tpu.memory_space<vmem>>, vector<1x32x1xf32>
    %74 = vector.shape_cast %73 : vector<1x32x1xf32> to vector<32x1xf32>
    %75 = vector.broadcast %74 : vector<32x1xf32> to vector<32x256xf32>
    %76 = arith.mulf %72, %75 : vector<32x256xf32>
    %c1_40 = arith.constant 1 : index
    %c0_41 = arith.constant 0 : index
    %c0_42 = arith.constant 0 : index
    %77 = vector.load %arg7[%c1_40, %c0_41, %c0_42] : memref<2x32x1xf32, #tpu.memory_space<vmem>>, vector<1x32x1xf32>
    %78 = vector.shape_cast %77 : vector<1x32x1xf32> to vector<32x1xf32>
    %79 = vector.broadcast %78 : vector<32x1xf32> to vector<32x256xf32>
    %80 = arith.addf %76, %79 : vector<32x256xf32>
    %cst_43 = arith.constant 0.000000e+00 : f32
    %81 = vector.broadcast %cst_43 : f32 to vector<32x256xf32>
    %82 = arith.maximumf %80, %81 : vector<32x256xf32>
    %c0_44 = arith.constant 0 : index
    %c0_45 = arith.constant 0 : index
    %83 = vector.load %arg8[%c0_44, %c0_45] : memref<1x32xbf16, #tpu.memory_space<vmem>>, vector<1x32xbf16>
    %84 = arith.truncf %82 : vector<32x256xf32> to vector<32x256xbf16>
    %cst_46 = arith.constant dense<0.000000e+00> : vector<1x256xf32>
    %85 = tpu.matmul %83, %84, %cst_46 {dimension_numbers = #tpu.dot_dimension_numbers<[1], [0], [0], [1], [0, 0, 1, 1], [], []>} : vector<1x32xbf16>, vector<32x256xbf16>, vector<1x256xf32> -> vector<1x256xf32>
    %c0_47 = arith.constant 0 : index
    %c0_48 = arith.constant 0 : index
    %86 = vector.load %arg9[%c0_47, %c0_48] : memref<1x1xf32, #tpu.memory_space<vmem>>, vector<1x1xf32>
    %87 = vector.broadcast %86 : vector<1x1xf32> to vector<1x256xf32>
    %88 = arith.addf %85, %87 : vector<1x256xf32>
    %89 = arith.negf %88 : vector<1x256xf32>
    %90 = math.exp %89 : vector<1x256xf32>
    %cst_49 = arith.constant 1.000000e+00 : f32
    %91 = vector.broadcast %cst_49 : f32 to vector<1x256xf32>
    %92 = arith.addf %91, %90 : vector<1x256xf32>
    %93 = arith.divf %91, %92 : vector<1x256xf32>
    %c0_50 = arith.constant 0 : index
    %c0_51 = arith.constant 0 : index
    %94 = vector.load %arg10[%c0_50, %c0_51] : memref<1x256xf32, #tpu.memory_space<vmem>>, vector<1x256xf32>
    tpu.vector_store %arg10[%c0_50, %c0_51], %93 {strides = array<i32>} : memref<1x256xf32, #tpu.memory_space<vmem>>, vector<1x256xf32>,
    return
  }
}

</mosaic_0001>

<bundles_post_ra>
// kernel: tpu_custom_call.1
= control target key start
LH: loop header
LB: loop body
LE: loop exit
PB: predicated region body
PF: predicated region fallthrough
CT: control target
= control target key end

     0   :  { %s1653_s0 = inlined_call_operand.vmem [shape: bf16[147,256], index: 0, kind: input, shape index: {}]   ;;  %s1654_s1 = inlined_call_operand.vmem [shape: f32[1,256], index: 1, kind: input, shape index: {}]   ;;  %s1655_s2 = inlined_call_operand.vmem [shape: bf16[32,147], index: 2, kind: input, shape index: {}]   ;;  %s1656_s3 = inlined_call_operand.vmem [shape: f32[32,1], index: 3, kind: input, shape index: {}]   ;;  %s1657_s4 = inlined_call_operand.vmem [shape: bf16[2,32,32], index: 4, kind: input, shape index: {}]   ;;  %s1658_s5 = inlined_call_operand.vmem [shape: f32[2,32,1], index: 5, kind: input, shape index: {}]   ;;  %s1659_s6 = inlined_call_operand.vmem [shape: f32[2,32,1], index: 6, kind: input, shape index: {}]   ;;  %s1660_s7 = inlined_call_operand.vmem [shape: f32[2,32,1], index: 7, kind: input, shape index: {}]   ;;  %s1661_s8 = inlined_call_operand.vmem [shape: bf16[1,32], index: 8, kind: input, shape index: {}]   ;;  %s1662_s9 = inlined_call_operand.<no memory space> [shape: f32[1,1], index: 9, kind: input, shape index: {}]   ;;  %s1663_s10 = inlined_call_operand.hbm [shape: f32[1,256], index: 10, kind: output, shape index: {}]  }
   0x1   :  { %v15_v0 = vstv %s1662_s9 }
   0x2   :  { %16 = vst [vmem:[#allocation2] sm:$0x1] %v15_v0 }
   0x3   :  { %v1030_v1 = vld [vmem:[%s1653_s0 + $0x70] sm:$0xf]  ;;  %v1111_v2 = vld [vmem:[%s1653_s0 + $0x74] sm:$0xf0]  ;;  %v1110_v3 = vld [vmem:[%s1653_s0 + $0x74] sm:$0xf] }
   0x4   :  { %v1031_v4 = vor.u32 %v1111_v2, %v1030_v1  ;;  %v1032_v5 = vld [vmem:[%s1653_s0 + $0x78] sm:$0xf0]  ;;  %v1022_v6 = vld [vmem:[%s1653_s0 + $0x60] sm:$0xf]  ;;  %v1109_v7 = vld [vmem:[%s1653_s0 + $0x64] sm:$0xf0] }
   0x5   :  { %v1035_v8 = vor.u32 %v1110_v3, %v1032_v5  ;;  %v1108_v9 = vld [vmem:[%s1653_s0 + $0x64] sm:$0xf]  ;;  %v1024_v10 = vld [vmem:[%s1653_s0 + $0x68] sm:$0xf0]  ;;  %v1023_v11 = vor.u32 %v1109_v7, %v1022_v6  ;;  %v1014_v13 = vld [vmem:[%s1653_s0 + $0x50] sm:$0xf] }
   0x6   :  { %216 = vmatpush.bf16.msra.mxu0 %v1031_v4  ;;  %v1027_v12 = vor.u32 %v1108_v9, %v1024_v10  ;;  %v1107_v14 = vld [vmem:[%s1653_s0 + $0x54] sm:$0xf0]  ;;  %v1106_v15 = vld [vmem:[%s1653_s0 + $0x54] sm:$0xf]  ;;  %v1016_v16 = vld [vmem:[%s1653_s0 + $0x58] sm:$0xf0] }
   0x7   :  { %254 = vmatpush.bf16.msra.mxu2 %v1035_v8  ;;  %v61_v17 = vld [vmem:[%s1653_s0 + $0x90] sm:$0x33]  ;;  %v1015_v18 = vor.u32 %v1107_v14, %v1014_v13  ;;  %vm206_vm0 = vcmask 1040384   ;;  %vm207_vm1 = vcmask 1041408   ;;  %v1019_v20 = vor.u32 %v1106_v15, %v1016_v16  ;;  %v1006_v21 = vld [vmem:[%s1653_s0 + $0x40] sm:$0xf] }
   0x8   :  { %v160_v19 = vunpack.c.h.b16 %v61_v17  ;;  %v1105_v22 = vld [vmem:[%s1653_s0 + $0x44] sm:$0xf0]  ;;  %v159_v23 = vunpack.c.l.b16 %v61_v17  ;;  %v1104_v24 = vld [vmem:[%s1653_s0 + $0x44] sm:$0xf]  ;;  %v1008_v25 = vld [vmem:[%s1653_s0 + $0x48] sm:$0xf0] }
   0x9   :  { %v1174_v27 = vmov 65535   ;;  %v1112_v30 = vld [vmem:[%s1653_s0 + $0x84] sm:$0xf]  ;;  %v1040_v31 = vld [vmem:[%s1653_s0 + $0x88] sm:$0xf0]  ;;  %v1175_v33 = vmov 0   ;;  %v1007_v35 = vor.u32 %v1105_v22, %v1006_v21  ;;  %v1011_v38 = vor.u32 %v1104_v24, %v1008_v25 }
   0xa   :  { %217 = vmatpush.bf16.msra.mxu0 %v1023_v11  ;;  %v180_v26 = vpack.c.b16 %v160_v19, %v160_v19  ;;  %v208_v28 = vsel %vm206_vm0, 4294967295, %v1174_v27  ;;  %v179_v32 = vpack.c.b16 %v159_v23, %v159_v23  ;;  %1121 = vset.pattern.permute.xlu0 %v1175_v33  ;;  %v64_v34 = vld [vmem:[%s1656_s3 + $0x10] sm:$0xff]  ;;  %v1103_v39 = vld [vmem:[%s1653_s0 + $0x34] sm:$0xf0]  ;;  %v1000_v41 = vld [vmem:[%s1653_s0 + $0x38] sm:$0xf0]  ;;  %v1043_v43 = vor.u32 %v1112_v30, %v1040_v31 }
   0xb   :  { %255 = vmatpush.bf16.msra.mxu2 %v1027_v12  ;;  %v209_v29 = vsel %vm207_vm1, %v208_v28, 0  ;;  %1122 = vset.pattern.permute.xlu1 %v1175_v33  ;;  %v998_v36 = vld [vmem:[%s1653_s0 + $0x30] sm:$0xf]  ;;  %v1102_v40 = vld [vmem:[%s1653_s0 + $0x34] sm:$0xf]  ;;  %v62_v50 = vld [vmem:[%s1656_s3] sm:$0xff] }
   0xc   :  { %v214_v37 = vand.u32 %v209_v29, %v180_v26  ;;  %78 = vperm.xlu0 %1121, %v64_v34   ;;  %v211_v42 = vand.u32 %v209_v29, %v179_v32  ;;  %1123 = vset.pattern.permute.xlu2 %v1175_v33  ;;  %v1092_v44 = vld [vmem:[%s1655_s2 + $0x4] sm:$0xf]  ;;  %v960_v45 = vld [vmem:[%s1655_s2 + $0x8] sm:$0xf0]  ;;  %v1038_v46 = vld [vmem:[%s1653_s0 + $0x80] sm:$0xf]  ;;  %v999_v48 = vor.u32 %v1103_v39, %v998_v36 }
   0xd   :  { %v1113_v47 = vld [vmem:[%s1653_s0 + $0x84] sm:$0xf0]  ;;  %v1003_v51 = vor.u32 %v1102_v40, %v1000_v41  ;;  %v990_v52 = vld [vmem:[%s1653_s0 + $0x20] sm:$0xf]  ;;  %v963_v54 = vor.u32 %v1092_v44, %v960_v45  ;;  %68 = vperm.xlu1 %1122, %v62_v50  }
   0xe   :  { %218 = vmatpush.bf16.msra.mxu0 %v1015_v18  ;;  %279 = vmatpush.bf16.msra.mxu3 %v214_v37  ;;  %v1039_v49 = vor.u32 %v1113_v47, %v1038_v46  ;;  %v1101_v53 = vld [vmem:[%s1653_s0 + $0x24] sm:$0xf0] }
   0xf   :  { %256 = vmatpush.bf16.msra.mxu2 %v1019_v20  ;;  %241 = vmatpush.bf16.msra.mxu1 %v211_v42 }
  0x12   :  { %219 = vmatpush.bf16.msra.mxu0 %v1007_v35 }
  0x13   :  { %257 = vmatpush.bf16.msra.mxu2 %v1011_v38 }
  0x14   :  { %17 = vsyncpa [#allocation4], 0  ;;  %v1100_v55 = vld [vmem:[%s1653_s0 + $0x24] sm:$0xf]  ;;  %v992_v56 = vld [vmem:[%s1653_s0 + $0x28] sm:$0xf0]  ;;  %280 = vmatpush.bf16.msra.mxu3 %v1043_v43  ;;  %242 = vmatpush.bf16.msra.mxu1 %v1039_v49  ;;  %v991_v57 = vor.u32 %v1101_v53, %v990_v52 }
  0x15   :  { %vm199_vm2 = vcmask 154624   ;;  %v65_v58 = vld [vmem:[%s1656_s3 + $0x18] sm:$0xff]  ;;  %v995_v59 = vor.u32 %v1100_v55, %v992_v56  ;;  %v982_v60 = vld [vmem:[%s1653_s0 + $0x10] sm:$0xf]  ;;  %v1098_v62 = vld [vmem:[%s1653_s0 + $0x14] sm:$0xf] }
  0x16   :  { %220 = vmatpush.bf16.msra.mxu0 %v999_v48  ;;  %v1099_v61 = vld [vmem:[%s1653_s0 + $0x14] sm:$0xf0]  ;;  %v984_v63 = vld [vmem:[%s1653_s0 + $0x18] sm:$0xf0]  ;;  %83 = vperm.xlu0 %1121, %v65_v58   ;;  %v63_v0 = vld [vmem:[%s1656_s3 + $0x8] sm:$0xff]  ;;  %vm335_vm3 = vcmask 261120  }
  0x17   :  { %258 = vmatpush.bf16.msra.mxu2 %v1003_v51  ;;  %1046 = vmatmul.msk.bf16.vlgmr.msra.gmra.mxu3 %vm199_vm2, %v963_v54  ;;  %v983_v1 = vor.u32 %v1099_v61, %v982_v60  ;;  %v987_v2 = vor.u32 %v1098_v62, %v984_v63  ;;  %v974_v3 = vld [vmem:[%s1653_s0] sm:$0xf]  ;;  %v1097_v4 = vld [vmem:[%s1653_s0 + $0x4] sm:$0xf0]  ;;  %v1096_v5 = vld [vmem:[%s1653_s0 + $0x4] sm:$0xf] }
  0x18   :  { %1044 = vmatmul.msk.bf16.vlgmr.msra.gmra.mxu1 %vm199_vm2, %v963_v54  ;;  %73 = vperm.xlu1 %1122, %v63_v0   ;;  %v976_v6 = vld [vmem:[%s1653_s0 + $0x8] sm:$0xf0]  ;;  %v301_v7 = vld [vmem:[%s1658_s5] sm:$0xff]  ;;  %v975_v8 = vor.u32 %v1097_v4, %v974_v3  ;;  %v1093_v10 = vld [vmem:[%s1655_s2 + $0x4] sm:$0xf0]  ;;  %s947_s14 = sshll.u32 %s1663_s10, 4  ;;  %s948_s14 = int_to_ptr.hbm [resolvable:$true] %s947_s14 }
  0x19   :  { %v958_v9 = vld [vmem:[%s1655_s2] sm:$0xf]  ;;  %v979_v11 = vor.u32 %v1096_v5, %v976_v6  ;;  %v1094_v12 = vld [vmem:[%s1655_s2 + $0x14] sm:$0xf]  ;;  %v968_v13 = vld [vmem:[%s1655_s2 + $0x18] sm:$0xf0] }
  0x1a   :  { %221 = vmatpush.bf16.msra.mxu0 %v991_v57  ;;  %v302_v14 = vld [vmem:[%s1658_s5 + $0x8] sm:$0xff]  ;;  %v959_v15 = vor.u32 %v1093_v10, %v958_v9  ;;  %v971_v16 = vor.u32 %v1094_v12, %v968_v13  ;;  %v503_v17 = vld [vmem:[%s1659_s6 + $0x10] sm:$0xff]  ;;  %v504_v18 = vld [vmem:[%s1659_s6 + $0x18] sm:$0xff] }
  0x1b   :  { %259 = vmatpush.bf16.msra.mxu2 %v995_v59  ;;  %v966_v19 = vld [vmem:[%s1655_s2 + $0x10] sm:$0xf]  ;;  %v1095_v20 = vld [vmem:[%s1655_s2 + $0x14] sm:$0xf0]  ;;  %v1114_v59 = vld [vmem:[%s1657_s4] sm:$0xff] }
  0x1c   :  { %v967_v21 = vor.u32 %v1095_v20, %v966_v19  ;;  %v303_v49 = vld [vmem:[%s1658_s5 + $0x10] sm:$0xff]  ;;  %v304_v62 = vld [vmem:[%s1658_s5 + $0x18] sm:$0xff]  ;;  %v292_v3 = vld [vmem:[%s1654_s1] sm:$0x3] }
  0x1d   :  { %317 = vperm.xlu2 %1123, %v303_v49   ;;  %v1418_v6 = vperm.slane %v292_v3, 0 }
  0x1e   :  { %222 = vmatpush.bf16.msra.mxu0 %v983_v1  ;;  %307 = vperm.xlu0 %1121, %v301_v7   ;;  %v1115_v1 = vld [vmem:[%s1657_s4 + $0x8] sm:$0xff]  ;;  %v1420_v7 = vperm.slane %v292_v3, 1 }
  0x1f   :  { %260 = vmatpush.bf16.msra.mxu2 %v987_v2 }
  0x20   :  { %312 = vperm.xlu1 %1122, %v302_v14  }
  0x22   :  { %223 = vmatpush.bf16.msra.mxu0 %v975_v8 }
  0x23   :  { %261 = vmatpush.bf16.msra.mxu2 %v979_v11 }
  0x25   :  { %224 = vmatmul.bf16.vlgmr.msra.gmra.mxu0 %v959_v15  ;;  %322 = vperm.xlu2 %1123, %v304_v62  }
  0x26   :  { %262 = vmatmul.bf16.vlgmr.msra.gmra.mxu2 %v959_v15  ;;  %517 = vperm.xlu0 %1121, %v503_v17  }
  0x27   :  { %1047 = vmatmul.msk.bf16.gmra.mxu3 %vm199_vm2, %v971_v16 }
  0x28   :  { %1045 = vmatmul.msk.bf16.gmra.mxu1 %vm199_vm2, %v971_v16  ;;  %522 = vperm.xlu1 %1122, %v504_v18  }
  0x35   :  { %229 = vmatmul.bf16.gmra.mxu0 %v967_v21 }
  0x36   :  { %267 = vmatmul.bf16.gmra.mxu2 %v967_v21 }
  0x77   :  { %v318_v18 = vpop.permute.xlu2 %317 }
  0x7e   :  { %v79_v28 = vpop.permute.xlu0 %78 }
  0x7f   :  { %v69_v29 = vpop.permute.xlu1 %68 }
  0x88   :  { %v84_v34 = vpop.permute.xlu0 %83 }
  0x8a   :  { %v74_v35 = vpop.permute.xlu1 %73 }
  0x90   :  { %v308_v4 = vpop.permute.xlu0 %307 }
  0x92   :  { %v313_v14 = vpop.permute.xlu1 %312 }
  0x95   :  { %v244_v22 = vpop.f32.mrf.mxu1 }
  0x9a   :  { %v282_v24 = vpop.f32.mrf.mxu3 }
  0x9d   :  { %v246_v25 = vpop.f32.mrf.mxu1 }
  0xa2   :  { %v225_v23 = vpop.f32.mrf.mxu0  ;;  %v284_v30 = vpop.f32.mrf.mxu3 }
  0xa3   :  { %v226_v41 = vadd.f32 %v225_v23, %v69_v29 }
  0xa5   :  { %v249_v31 = vpop.f32.mrf.mxu1  ;;  %v245_v46 = vadd.f32 %v244_v22, %v226_v41 }
  0xa9   :  { %v263_v26 = vpop.f32.mrf.mxu2 }
  0xaa   :  { %v227_v27 = vpop.f32.mrf.mxu0  ;;  %v287_v37 = vpop.f32.mrf.mxu3  ;;  %v264_v56 = vadd.f32 %v263_v26, %v69_v29 }
  0xab   :  { %v228_v42 = vadd.f32 %v227_v27, %v74_v35 }
  0xac   :  { %v283_v63 = vadd.f32 %v282_v24, %v264_v56 }
  0xad   :  { %v251_v40 = vpop.f32.mrf.mxu1  ;;  %v247_v47 = vadd.f32 %v246_v25, %v228_v42 }
  0xaf   :  { %v297_v55 = vpack.c.bf16 %v247_v47, %v245_v46 }
  0xb1   :  { %v265_v32 = vpop.f32.mrf.mxu2 }
  0xb2   :  { %v230_v33 = vpop.f32.mrf.mxu0  ;;  %v266_v52 = vadd.f32 %v265_v32, %v74_v35  ;;  %v289_v54 = vpop.f32.mrf.mxu3 }
  0xb3   :  { %v231_v36 = vadd.f32 %v230_v33, %v79_v28 }
  0xb4   :  { %v285_v60 = vadd.f32 %v284_v30, %v266_v52 }
  0xb5   :  { %v250_v44 = vadd.f32 %v249_v31, %v231_v36 }
  0xb6   :  { %v298_v0 = vpack.c.bf16 %v285_v60, %v283_v63 }
  0xb9   :  { %v268_v38 = vpop.f32.mrf.mxu2 }
  0xba   :  { %v232_v39 = vpop.f32.mrf.mxu0  ;;  %v269_v50 = vadd.f32 %v268_v38, %v79_v28  ;;  %v323_v28 = vpop.permute.xlu2 %322  ;;  %v535_v38 = vld [vmem:[%s1660_s7 + $0x10] sm:$0xff] }
  0xbb   :  { %v233_v43 = vadd.f32 %v232_v39, %v84_v34  ;;  %v536_v39 = vld [vmem:[%s1660_s7 + $0x18] sm:$0xff] }
  0xbc   :  { %v288_v57 = vadd.f32 %v287_v37, %v269_v50  ;;  %v501_v37 = vld [vmem:[%s1659_s6] sm:$0xff] }
  0xbd   :  { %v252_v45 = vadd.f32 %v251_v40, %v233_v43  ;;  %v1439_v40 = vpop.permute.xlu1 %522 }
  0xbf   :  { %v299_v48 = vpack.c.bf16 %v252_v45, %v250_v44 }
  0xc1   :  { %v270_v51 = vpop.f32.mrf.mxu2  ;;  %348 = vmatpush.bf16.msrb.mxu1 %v299_v48 }
  0xc2   :  { %v271_v53 = vadd.f32 %v270_v51, %v84_v34 }
  0xc4   :  { %v290_v58 = vadd.f32 %v289_v54, %v271_v53 }
  0xc5   :  { %349 = vmatpush.bf16.msrb.mxu1 %v297_v55 }
  0xc6   :  { %v300_v61 = vpack.c.bf16 %v290_v58, %v288_v57  ;;  %v1461_v58 = vpop.permute.xlu0 %517 }
  0xc8   :  { %367 = vmatpush.bf16.msrb.mxu3 %v300_v61  ;;  %1056 = vmatmul.msk.bf16.vlgmr.msrb.gmra.mxu1 %vm335_vm3, %v1114_v59 }
  0xcc   :  { %368 = vmatpush.bf16.msrb.mxu3 %v298_v0 }
  0xcf   :  { %1058 = vmatmul.msk.bf16.vlgmr.msrb.gmra.mxu3 %vm335_vm3, %v1114_v59 }
  0xd8   :  { %1057 = vmatmul.msk.bf16.gmra.mxu1 %vm335_vm3, %v1115_v1 }
  0xdf   :  { %1059 = vmatmul.msk.bf16.gmra.mxu3 %vm335_vm3, %v1115_v1 }
 0x145   :  { %v351_v2 = vpop.f32.mrf.mxu1 }
 0x146   :  { %v352_v5 = vadd.f32 %v351_v2, %v308_v4 }
 0x148   :  { %v385_v11 = vmul.f32 %v1418_v6, %v352_v5 }
 0x14d   :  { %v353_v10 = vpop.f32.mrf.mxu1 }
 0x14e   :  { %v354_v15 = vadd.f32 %v353_v10, %v313_v14 }
 0x150   :  { %v387_v20 = vmul.f32 %v1418_v6, %v354_v15 }
 0x152   :  { %v370_v8 = vpop.f32.mrf.mxu3 }
 0x153   :  { %v371_v9 = vadd.f32 %v370_v8, %v308_v4 }
 0x155   :  { %v386_v12 = vmul.f32 %v1420_v7, %v371_v9  ;;  %v356_v19 = vpop.f32.mrf.mxu1 }
 0x156   :  { %v357_v22 = vadd.f32 %v356_v19, %v318_v18  ;;  %v502_v19 = vld [vmem:[%s1659_s6 + $0x8] sm:$0xff] }
 0x157   :  { %v393_v13 = vadd.f32 %v386_v12, %v385_v11 }
 0x158   :  { %v389_v25 = vmul.f32 %v1418_v6, %v357_v22 }
 0x159   :  { %394 = vadd.xlane.f32.xlu1 %v393_v13 }
 0x15a   :  { %v372_v16 = vpop.f32.mrf.mxu3 }
 0x15b   :  { %v373_v17 = vadd.f32 %v372_v16, %v313_v14  ;;  %v534_v16 = vld [vmem:[%s1660_s7 + $0x8] sm:$0xff] }
 0x15d   :  { %v388_v21 = vmul.f32 %v1420_v7, %v373_v17  ;;  %v358_v29 = vpop.f32.mrf.mxu1 }
 0x15e   :  { %v359_v31 = vadd.f32 %v358_v29, %v323_v28 }
 0x15f   :  { %v396_v23 = vadd.f32 %v388_v21, %v387_v20  ;;  %v1067_v20 = vld [vmem:[%s1658_s5 + $0x38] sm:$0xff]  ;;  %v1066_v21 = vld [vmem:[%s1658_s5 + $0x30] sm:$0xff] }
 0x160   :  { %v391_v34 = vmul.f32 %v1418_v6, %v359_v31 }
 0x161   :  { %397 = vadd.xlane.f32.xlu2 %v396_v23  ;;  %v1065_v23 = vld [vmem:[%s1658_s5 + $0x28] sm:$0xff] }
 0x162   :  { %v375_v24 = vpop.f32.mrf.mxu3 }
 0x163   :  { %v376_v26 = vadd.f32 %v375_v24, %v318_v18  ;;  %v533_v18 = vld [vmem:[%s1660_s7] sm:$0xff]  ;;  %v1082_v24 = vld [vmem:[%s1659_s6 + $0x30] sm:$0xff] }
 0x165   :  { %v390_v27 = vmul.f32 %v1420_v7, %v376_v26 }
 0x167   :  { %v399_v30 = vadd.f32 %v390_v27, %v389_v25 }
 0x169   :  { %400 = vadd.xlane.f32.xlu2 %v399_v30 }
 0x16a   :  { %v377_v32 = vpop.f32.mrf.mxu3 }
 0x16b   :  { %v378_v33 = vadd.f32 %v377_v32, %v323_v28 }
 0x16d   :  { %v392_v35 = vmul.f32 %v1420_v7, %v378_v33 }
 0x16f   :  { %v402_v36 = vadd.f32 %v392_v35, %v391_v34 }
 0x171   :  { %403 = vadd.xlane.f32.xlu0 %v402_v36 }
 0x172   :  { %507 = vperm.xlu1 %1122, %v501_v37  }
 0x181   :  { %549 = vperm.xlu2 %1123, %v535_v38  }
 0x185   :  { %554 = vperm.xlu0 %1121, %v536_v39  }
 0x1cc   :  { %v395_v41 = vpop.xlane.xlu1 %394 }
 0x1cd   :  { %v405_v42 = vmul.f32 0.005, %v395_v41 }
 0x1cf   :  { %v1441_v43 = vsub.f32 %v352_v5, %v405_v42  ;;  %v1443_v44 = vsub.f32 %v371_v9, %v405_v42 }
 0x1d1   :  { %v417_v45 = vmul.f32 %v1441_v43, %v1441_v43  ;;  %v418_v46 = vmul.f32 %v1443_v44, %v1443_v44 }
 0x1d3   :  { %v425_v47 = vmul.f32 %v417_v45, %v1418_v6  ;;  %v426_v48 = vmul.f32 %v418_v46, %v1420_v7 }
 0x1d4   :  { %v398_v49 = vpop.xlane.xlu2 %397 }
 0x1d5   :  { %v406_v50 = vmul.f32 0.005, %v398_v49  ;;  %v433_v51 = vadd.f32 %v426_v48, %v425_v47 }
 0x1d7   :  { %v1451_v52 = vsub.f32 %v354_v15, %v406_v50  ;;  %v1453_v53 = vsub.f32 %v373_v17, %v406_v50  ;;  %434 = vadd.xlane.f32.xlu1 %v433_v51  ;;  %v1064_v17 = vld [vmem:[%s1658_s5 + $0x20] sm:$0xff] }
 0x1d9   :  { %v419_v54 = vmul.f32 %v1451_v52, %v1451_v52  ;;  %v420_v55 = vmul.f32 %v1453_v53, %v1453_v53 }
 0x1db   :  { %v427_v56 = vmul.f32 %v419_v54, %v1418_v6  ;;  %v428_v57 = vmul.f32 %v420_v55, %v1420_v7 }
 0x1dc   :  { %v401_v59 = vpop.xlane.xlu2 %400 }
 0x1dd   :  { %v407_v60 = vmul.f32 0.005, %v401_v59  ;;  %v436_v61 = vadd.f32 %v428_v57, %v427_v56 }
 0x1df   :  { %v1463_v62 = vsub.f32 %v357_v22, %v407_v60  ;;  %v1465_v63 = vsub.f32 %v376_v26, %v407_v60  ;;  %437 = vadd.xlane.f32.xlu2 %v436_v61  ;;  %v1083_v22 = vld [vmem:[%s1659_s6 + $0x38] sm:$0xff] }
 0x1e1   :  { %v421_v0 = vmul.f32 %v1463_v62, %v1463_v62  ;;  %v422_v1 = vmul.f32 %v1465_v63, %v1465_v63 }
 0x1e3   :  { %v429_v2 = vmul.f32 %v421_v0, %v1418_v6  ;;  %v430_v3 = vmul.f32 %v422_v1, %v1420_v7 }
 0x1e4   :  { %v404_v4 = vpop.xlane.xlu0 %403  ;;  %v1510_v25 = vpop.permute.xlu1 %507 }
 0x1e5   :  { %v408_v5 = vmul.f32 0.005, %v404_v4  ;;  %v439_v8 = vadd.f32 %v430_v3, %v429_v2  ;;  %v1512_v26 = vpop.permute.xlu2 %549 }
 0x1e7   :  { %v1473_v9 = vsub.f32 %v359_v31, %v408_v5  ;;  %v1475_v10 = vsub.f32 %v378_v33, %v408_v5  ;;  %440 = vadd.xlane.f32.xlu2 %v439_v8 }
 0x1e9   :  { %v423_v11 = vmul.f32 %v1473_v9, %v1473_v9  ;;  %v424_v12 = vmul.f32 %v1475_v10, %v1475_v10 }
 0x1eb   :  { %v431_v13 = vmul.f32 %v423_v11, %v1418_v6  ;;  %v432_v14 = vmul.f32 %v424_v12, %v1420_v7 }
 0x1ed   :  { %v442_v15 = vadd.f32 %v432_v14, %v431_v13 }
 0x1ef   :  { %443 = vadd.xlane.f32.xlu0 %v442_v15 }
 0x1f0   :  { %544 = vperm.xlu1 %1122, %v534_v16  }
 0x1f7   :  { %v1514_v33 = vpop.permute.xlu0 %554 }
 0x1f8   :  { %589 = vperm.xlu1 %1122, %v1064_v17  }
 0x1ff   :  { %539 = vperm.xlu2 %1123, %v533_v18  }
 0x203   :  { %512 = vperm.xlu0 %1121, %v502_v19  }
 0x207   :  { %604 = vperm.xlu2 %1123, %v1067_v20  }
 0x20b   :  { %599 = vperm.xlu0 %1121, %v1066_v21  }
 0x20f   :  { %799 = vperm.xlu2 %1123, %v1083_v22  }
 0x213   :  { %594 = vperm.xlu0 %1121, %v1065_v23  }
 0x21b   :  { %794 = vperm.xlu0 %1121, %v1082_v24  }
 0x24a   :  { %v435_v27 = vpop.xlane.xlu1 %434 }
 0x24b   :  { %v445_v28 = vmul.f32 0.005, %v435_v27 }
 0x24d   :  { %v449_v29 = vadd.f32 1e-05, %v445_v28 }
 0x24f   :  { %1124 = vrsqrt.f32 %v449_v29  ;;  %vm459_vm9 = vweird.f32 %v449_v29 }
 0x252   :  { %v438_v30 = vpop.xlane.xlu2 %437 }
 0x253   :  { %v446_v31 = vmul.f32 0.005, %v438_v30 }
 0x255   :  { %v450_v32 = vadd.f32 1e-05, %v446_v31  ;;  %v1125_v36 = vpop.eup %1124 }
 0x256   :  { %v454_v39 = vmul.f32 %v1125_v36, %v449_v29  ;;  %vm460_vm6 = vweird.f32 %v1125_v36 }
 0x257   :  { %1126 = vrsqrt.f32 %v450_v32  ;;  %vm461_vm10 = vmor %vm459_vm9, %vm460_vm6  ;;  %vm469_vm11 = vweird.f32 %v450_v32 }
 0x258   :  { %v455_v45 = vmul.f32 %v1125_v36, %v454_v39 }
 0x25a   :  { %v441_v34 = vpop.xlane.xlu2 %440  ;;  %v456_v51 = vmul.f32 0.5, %v455_v45 }
 0x25b   :  { %v447_v35 = vmul.f32 0.005, %v441_v34 }
 0x25c   :  { %v457_v57 = vsub.f32 1.5, %v456_v51 }
 0x25d   :  { %v1127_v37 = vpop.eup %1126  ;;  %v451_v38 = vadd.f32 1e-05, %v447_v35 }
 0x25e   :  { %v464_v41 = vmul.f32 %v1127_v37, %v450_v32  ;;  %v458_v2 = vmul.f32 %v1125_v36, %v457_v57  ;;  %vm470_vm8 = vweird.f32 %v1127_v37 }
 0x25f   :  { %1128 = vrsqrt.f32 %v451_v38  ;;  %vm479_vm5 = vweird.f32 %v451_v38  ;;  %vm471_vm12 = vmor %vm469_vm11, %vm470_vm8 }
 0x260   :  { %v465_v47 = vmul.f32 %v1127_v37, %v464_v41  ;;  %v462_v11 = vsel %vm461_vm10, %v1125_v36, %v458_v2 }
 0x261   :  { %v493_v17 = vmul.f32 %v462_v11, %v1441_v43  ;;  %v494_v18 = vmul.f32 %v462_v11, %v1443_v44 }
 0x262   :  { %v444_v42 = vpop.xlane.xlu0 %443  ;;  %v466_v54 = vmul.f32 0.5, %v465_v47  ;;  %v540_v31 = vpop.permute.xlu2 %539 }
 0x263   :  { %v448_v46 = vmul.f32 0.005, %v444_v42  ;;  %v525_v43 = vmul.f32 %v1510_v25, %v493_v17  ;;  %v526_v44 = vmul.f32 %v1510_v25, %v494_v18 }
 0x264   :  { %v467_v59 = vsub.f32 1.5, %v466_v54 }
 0x265   :  { %v1129_v48 = vpop.eup %1128  ;;  %v452_v49 = vadd.f32 1e-05, %v448_v46  ;;  %v557_v35 = vadd.f32 %v540_v31, %v525_v43  ;;  %v558_v36 = vadd.f32 %v540_v31, %v526_v44  ;;  %v1086_v43 = vld [vmem:[%s1660_s7 + $0x30] sm:$0xff] }
 0x266   :  { %v474_v50 = vmul.f32 %v1129_v48, %v451_v38  ;;  %vm480_vm4 = vweird.f32 %v1129_v48  ;;  %v468_v5 = vmul.f32 %v1127_v37, %v467_v59 }
 0x267   :  { %1130 = vrsqrt.f32 %v452_v49  ;;  %vm481_vm7 = vmor %vm479_vm5, %vm480_vm4  ;;  %vm489_vm14 = vweird.f32 %v452_v49  ;;  %v565_v46 = vmax.f32 %v557_v35, 0.0 }
 0x268   :  { %v475_v55 = vmul.f32 %v1129_v48, %v474_v50  ;;  %v472_v15 = vsel %vm471_vm12, %v1127_v37, %v468_v5 }
 0x269   :  { %v495_v20 = vmul.f32 %v472_v15, %v1451_v52  ;;  %v496_v21 = vmul.f32 %v472_v15, %v1453_v53 }
 0x26a   :  { %v476_v56 = vmul.f32 0.5, %v475_v55 }
 0x26c   :  { %v477_v60 = vsub.f32 1.5, %v476_v56 }
 0x26d   :  { %v1131_v61 = vpop.eup %1130 }
 0x26e   :  { %v478_v0 = vmul.f32 %v1129_v48, %v477_v60  ;;  %v484_v1 = vmul.f32 %v1131_v61, %v452_v49  ;;  %vm490_vm13 = vweird.f32 %v1131_v61  ;;  %v1117_v49 = vld [vmem:[%s1657_s4 + $0x18] sm:$0xff] }
 0x26f   :  { %vm491_vm15 = vmor %vm489_vm14, %vm490_vm13 }
 0x270   :  { %v482_v3 = vsel %vm481_vm7, %v1129_v48, %v478_v0  ;;  %v485_v4 = vmul.f32 %v1131_v61, %v484_v1 }
 0x271   :  { %v497_v12 = vmul.f32 %v482_v3, %v1463_v62  ;;  %v498_v13 = vmul.f32 %v482_v3, %v1465_v63 }
 0x272   :  { %v486_v8 = vmul.f32 0.5, %v485_v4 }
 0x273   :  { %v529_v22 = vmul.f32 %v1461_v58, %v497_v12  ;;  %v530_v62 = vmul.f32 %v1461_v58, %v498_v13  ;;  %v545_v58 = vpop.permute.xlu1 %544 }
 0x274   :  { %v487_v14 = vsub.f32 1.5, %v486_v8 }
 0x275   :  { %v513_v19 = vpop.permute.xlu0 %512  ;;  %v561_v52 = vadd.f32 %v1512_v26, %v529_v22  ;;  %v562_v30 = vadd.f32 %v1512_v26, %v530_v62  ;;  %v566_v26 = vmax.f32 %v558_v36, 0.0  ;;  %v1087_v62 = vld [vmem:[%s1660_s7 + $0x38] sm:$0xff] }
 0x276   :  { %v488_v16 = vmul.f32 %v1131_v61, %v487_v14  ;;  %v527_v23 = vmul.f32 %v513_v19, %v495_v20  ;;  %v528_v24 = vmul.f32 %v513_v19, %v496_v21  ;;  %v605_v20 = vpop.permute.xlu2 %604 }
 0x277   :  { %v569_v37 = vmax.f32 %v561_v52, 0.0  ;;  %v570_v38 = vmax.f32 %v562_v30, 0.0 }
 0x278   :  { %v492_v63 = vsel %vm491_vm15, %v1131_v61, %v488_v16  ;;  %v559_v32 = vadd.f32 %v545_v58, %v527_v23  ;;  %v560_v34 = vadd.f32 %v545_v58, %v528_v24 }
 0x279   :  { %v499_v27 = vmul.f32 %v492_v63, %v1473_v9  ;;  %v500_v28 = vmul.f32 %v492_v63, %v1475_v10 }
 0x27a   :  { %v567_v45 = vmax.f32 %v559_v32, 0.0 }
 0x27b   :  { %v531_v29 = vmul.f32 %v1439_v40, %v499_v27  ;;  %v532_v53 = vmul.f32 %v1439_v40, %v500_v28  ;;  %v568_v40 = vmax.f32 %v560_v34, 0.0  ;;  %v590_v54 = vpop.permute.xlu1 %589  ;;  %v1080_v28 = vld [vmem:[%s1659_s6 + $0x20] sm:$0xff] }
 0x27c   :  { %v578_v47 = vpack.c.bf16 %v567_v45, %v565_v46 }
 0x27d   :  { %v563_v9 = vadd.f32 %v1514_v33, %v531_v29  ;;  %v564_v10 = vadd.f32 %v1514_v33, %v532_v53  ;;  %v579_v48 = vpack.c.bf16 %v568_v40, %v566_v26  ;;  %v1116_v33 = vld [vmem:[%s1657_s4 + $0x10] sm:$0xff]  ;;  %v600_v51 = vpop.permute.xlu0 %599 }
 0x27e   :  { %v1563_v29 = vpop.permute.xlu2 %799 }
 0x27f   :  { %v571_v25 = vmax.f32 %v563_v9, 0.0  ;;  %v572_v39 = vmax.f32 %v564_v10, 0.0 }
 0x281   :  { %v580_v41 = vpack.c.bf16 %v571_v25, %v569_v37  ;;  %v581_v42 = vpack.c.bf16 %v572_v39, %v570_v38 }
 0x283   :  { %629 = vmatpush.bf16.msrb.mxu0 %v580_v41  ;;  %648 = vmatpush.bf16.msrb.mxu2 %v581_v42 }
 0x285   :  { %v595_v1 = vpop.permute.xlu0 %594 }
 0x287   :  { %630 = vmatpush.bf16.msrb.mxu0 %v578_v47  ;;  %649 = vmatpush.bf16.msrb.mxu2 %v579_v48 }
 0x28a   :  { %1076 = vmatmul.msk.bf16.vlgmr.msrb.gmra.mxu0 %vm335_vm3, %v1116_v33  ;;  %1078 = vmatmul.msk.bf16.vlgmr.msrb.gmra.mxu2 %vm335_vm3, %v1116_v33 }
 0x28d   :  { %v1561_v44 = vpop.permute.xlu0 %794 }
 0x29a   :  { %1077 = vmatmul.msk.bf16.gmra.mxu0 %vm335_vm3, %v1117_v49  ;;  %1079 = vmatmul.msk.bf16.gmra.mxu2 %vm335_vm3, %v1117_v49 }
 0x307   :  { %v632_v50 = vpop.f32.mrf.mxu0 }
 0x308   :  { %v633_v55 = vadd.f32 %v632_v50, %v590_v54 }
 0x30a   :  { %v661_v60 = vmul.f32 %v633_v55, %v1418_v6 }
 0x30d   :  { %v651_v56 = vpop.f32.mrf.mxu2 }
 0x30e   :  { %v652_v57 = vadd.f32 %v651_v56, %v590_v54 }
 0x30f   :  { %v634_v59 = vpop.f32.mrf.mxu0 }
 0x310   :  { %v662_v61 = vmul.f32 %v652_v57, %v1420_v7  ;;  %v635_v2 = vadd.f32 %v634_v59, %v595_v1 }
 0x312   :  { %v669_v0 = vadd.f32 %v662_v61, %v661_v60  ;;  %v663_v8 = vmul.f32 %v635_v2, %v1418_v6 }
 0x314   :  { %670 = vadd.xlane.f32.xlu0 %v669_v0 }
 0x315   :  { %v653_v3 = vpop.f32.mrf.mxu2 }
 0x316   :  { %v654_v4 = vadd.f32 %v653_v3, %v595_v1  ;;  %v1085_v1 = vld [vmem:[%s1660_s7 + $0x28] sm:$0xff]  ;;  %v1084_v3 = vld [vmem:[%s1660_s7 + $0x20] sm:$0xff] }
 0x317   :  { %v637_v5 = vpop.f32.mrf.mxu0 }
 0x318   :  { %v664_v11 = vmul.f32 %v654_v4, %v1420_v7  ;;  %v638_v13 = vadd.f32 %v637_v5, %v600_v51 }
 0x31a   :  { %v672_v12 = vadd.f32 %v664_v11, %v663_v8  ;;  %v665_v16 = vmul.f32 %v638_v13, %v1418_v6 }
 0x31c   :  { %673 = vadd.xlane.f32.xlu2 %v672_v12 }
 0x31d   :  { %v656_v14 = vpop.f32.mrf.mxu2 }
 0x31e   :  { %v657_v15 = vadd.f32 %v656_v14, %v600_v51 }
 0x31f   :  { %v639_v18 = vpop.f32.mrf.mxu0 }
 0x320   :  { %v666_v17 = vmul.f32 %v657_v15, %v1420_v7  ;;  %v640_v21 = vadd.f32 %v639_v18, %v605_v20 }
 0x322   :  { %v675_v19 = vadd.f32 %v666_v17, %v665_v16  ;;  %v667_v23 = vmul.f32 %v640_v21, %v1418_v6 }
 0x324   :  { %676 = vadd.xlane.f32.xlu2 %v675_v19 }
 0x325   :  { %v658_v22 = vpop.f32.mrf.mxu2 }
 0x326   :  { %v659_v63 = vadd.f32 %v658_v22, %v605_v20 }
 0x328   :  { %v668_v24 = vmul.f32 %v659_v63, %v1420_v7  ;;  %832 = vperm.xlu0 %1121, %v1087_v62  }
 0x32a   :  { %v678_v27 = vadd.f32 %v668_v24, %v667_v23 }
 0x32c   :  { %679 = vadd.xlane.f32.xlu1 %v678_v27 }
 0x33c   :  { %784 = vperm.xlu2 %1123, %v1080_v28  }
 0x345   :  { %827 = vperm.xlu1 %1122, %v1086_v43  }
 0x387   :  { %v671_v52 = vpop.xlane.xlu0 %670 }
 0x388   :  { %v681_v53 = vmul.f32 0.005, %v671_v52 }
 0x38a   :  { %v1565_v30 = vsub.f32 %v633_v55, %v681_v53  ;;  %v1567_v58 = vsub.f32 %v652_v57, %v681_v53 }
 0x38c   :  { %v693_v31 = vmul.f32 %v1565_v30, %v1565_v30  ;;  %v694_v32 = vmul.f32 %v1567_v58, %v1567_v58 }
 0x38e   :  { %v701_v34 = vmul.f32 %v693_v31, %v1418_v6  ;;  %v702_v9 = vmul.f32 %v694_v32, %v1420_v7 }
 0x38f   :  { %v674_v10 = vpop.xlane.xlu2 %673 }
 0x390   :  { %v682_v35 = vmul.f32 0.005, %v674_v10  ;;  %v709_v36 = vadd.f32 %v702_v9, %v701_v34 }
 0x392   :  { %v1575_v37 = vsub.f32 %v635_v2, %v682_v35  ;;  %v1577_v25 = vsub.f32 %v654_v4, %v682_v35  ;;  %710 = vadd.xlane.f32.xlu2 %v709_v36  ;;  %v1081_v4 = vld [vmem:[%s1659_s6 + $0x28] sm:$0xff] }
 0x394   :  { %v695_v38 = vmul.f32 %v1575_v37, %v1575_v37  ;;  %v696_v39 = vmul.f32 %v1577_v25, %v1577_v25 }
 0x396   :  { %v703_v41 = vmul.f32 %v695_v38, %v1418_v6  ;;  %v704_v42 = vmul.f32 %v696_v39, %v1420_v7 }
 0x397   :  { %v677_v45 = vpop.xlane.xlu2 %676 }
 0x398   :  { %v683_v40 = vmul.f32 0.005, %v677_v45  ;;  %v712_v46 = vadd.f32 %v704_v42, %v703_v41 }
 0x39a   :  { %v1585_v26 = vsub.f32 %v638_v13, %v683_v40  ;;  %v1587_v47 = vsub.f32 %v657_v15, %v683_v40  ;;  %713 = vadd.xlane.f32.xlu1 %v712_v46  ;;  %v1618_v16 = vpop.permute.xlu0 %832 }
 0x39c   :  { %v697_v48 = vmul.f32 %v1585_v26, %v1585_v26  ;;  %v698_v33 = vmul.f32 %v1587_v47, %v1587_v47 }
 0x39e   :  { %v705_v49 = vmul.f32 %v697_v48, %v1418_v6  ;;  %v706_v50 = vmul.f32 %v698_v33, %v1420_v7 }
 0x39f   :  { %v680_v51 = vpop.xlane.xlu1 %679 }
 0x3a0   :  { %v684_v54 = vmul.f32 0.005, %v680_v51  ;;  %v715_v55 = vadd.f32 %v706_v50, %v705_v49 }
 0x3a2   :  { %v1595_v56 = vsub.f32 %v640_v21, %v684_v54  ;;  %v1597_v57 = vsub.f32 %v659_v63, %v684_v54  ;;  %716 = vadd.xlane.f32.xlu1 %v715_v55 }
 0x3a4   :  { %v699_v59 = vmul.f32 %v1595_v56, %v1595_v56  ;;  %v700_v60 = vmul.f32 %v1597_v57, %v1597_v57 }
 0x3a6   :  { %v707_v61 = vmul.f32 %v699_v59, %v1418_v6  ;;  %v708_v0 = vmul.f32 %v700_v60, %v1420_v7  ;;  %v856_v6 = vld [vmem:[#allocation2] sm:$0x1]  ;;  %v1614_v7 = vpop.permute.xlu2 %784 }
 0x3a8   :  { %v718_v2 = vadd.f32 %v708_v0, %v707_v61 }
 0x3aa   :  { %822 = vperm.xlu2 %1123, %v1085_v1   ;;  %719 = vadd.xlane.f32.xlu0 %v718_v2 }
 0x3b7   :  { %v1616_v5 = vpop.permute.xlu1 %827 }
 0x3bb   :  { %817 = vperm.xlu1 %1122, %v1084_v3  }
 0x3be   :  { %789 = vperm.xlu0 %1121, %v1081_v4  }
 0x3c6   :  { %859 = vperm.xlu0 %1121, %v856_v6  }
 0x405   :  { %v711_v8 = vpop.xlane.xlu2 %710 }
 0x406   :  { %v721_v11 = vmul.f32 0.005, %v711_v8 }
 0x408   :  { %v725_v14 = vadd.f32 1e-05, %v721_v11 }
 0x40a   :  { %vm735_vm8 = vweird.f32 %v725_v14 }
 0x40d   :  { %v714_v12 = vpop.xlane.xlu1 %713 }
 0x40e   :  { %v722_v13 = vmul.f32 0.005, %v714_v12  ;;  %v823_v12 = vpop.permute.xlu2 %822 }
 0x410   :  { %v726_v15 = vadd.f32 1e-05, %v722_v13 }
 0x412   :  { %1132 = vrsqrt.f32 %v726_v15  ;;  %vm745_vm7 = vweird.f32 %v726_v15 }
 0x413   :  { %1134 = vrsqrt.f32 %v725_v14 }
 0x415   :  { %v717_v17 = vpop.xlane.xlu1 %716 }
 0x416   :  { %v723_v18 = vmul.f32 0.005, %v717_v17 }
 0x418   :  { %v1133_v19 = vpop.eup %1132  ;;  %v727_v20 = vadd.f32 1e-05, %v723_v18 }
 0x419   :  { %v1135_v21 = vpop.eup %1134  ;;  %v740_v22 = vmul.f32 %v1133_v19, %v726_v15  ;;  %vm746_vm5 = vweird.f32 %v1133_v19 }
 0x41a   :  { %1136 = vrsqrt.f32 %v727_v20  ;;  %v730_v62 = vmul.f32 %v1135_v21, %v725_v14  ;;  %vm755_vm2 = vweird.f32 %v727_v20  ;;  %vm736_vm6 = vweird.f32 %v1135_v21  ;;  %vm747_vm9 = vmor %vm745_vm7, %vm746_vm5 }
 0x41b   :  { %v741_v24 = vmul.f32 %v1133_v19, %v740_v22  ;;  %vm737_vm10 = vmor %vm735_vm8, %vm736_vm6 }
 0x41c   :  { %v731_v28 = vmul.f32 %v1135_v21, %v730_v62 }
 0x41d   :  { %v720_v63 = vpop.xlane.xlu0 %719  ;;  %v742_v53 = vmul.f32 0.5, %v741_v24 }
 0x41e   :  { %v724_v23 = vmul.f32 0.005, %v720_v63  ;;  %v732_v32 = vmul.f32 0.5, %v731_v28 }
 0x41f   :  { %v743_v9 = vsub.f32 1.5, %v742_v53 }
 0x420   :  { %v1137_v27 = vpop.eup %1136  ;;  %v728_v43 = vadd.f32 1e-05, %v724_v23  ;;  %v733_v36 = vsub.f32 1.5, %v732_v32 }
 0x421   :  { %v750_v52 = vmul.f32 %v1137_v27, %v727_v20  ;;  %vm756_vm1 = vweird.f32 %v1137_v27  ;;  %v744_v45 = vmul.f32 %v1133_v19, %v743_v9 }
 0x422   :  { %1138 = vrsqrt.f32 %v728_v43  ;;  %vm757_vm4 = vmor %vm755_vm2, %vm756_vm1  ;;  %v734_v40 = vmul.f32 %v1135_v21, %v733_v36  ;;  %vm765_vm12 = vweird.f32 %v728_v43 }
 0x423   :  { %v751_v31 = vmul.f32 %v1137_v27, %v750_v52  ;;  %v748_v50 = vsel %vm747_vm9, %v1133_v19, %v744_v45 }
 0x424   :  { %v738_v51 = vsel %vm737_vm10, %v1135_v21, %v734_v40  ;;  %v771_v61 = vmul.f32 %v748_v50, %v1575_v37  ;;  %v772_v0 = vmul.f32 %v748_v50, %v1577_v25 }
 0x425   :  { %v752_v34 = vmul.f32 0.5, %v751_v31  ;;  %v770_v1 = vmul.f32 %v738_v51, %v1567_v58 }
 0x427   :  { %v753_v10 = vsub.f32 1.5, %v752_v34  ;;  %v803_v58 = vmul.f32 %v1614_v7, %v770_v1 }
 0x428   :  { %v1139_v35 = vpop.eup %1138 }
 0x429   :  { %v754_v38 = vmul.f32 %v1137_v27, %v753_v10  ;;  %v760_v39 = vmul.f32 %v1139_v35, %v728_v43  ;;  %vm766_vm11 = vweird.f32 %v1139_v35 }
 0x42a   :  { %vm767_vm13 = vmor %vm765_vm12, %vm766_vm11 }
 0x42b   :  { %v758_v41 = vsel %vm757_vm4, %v1137_v27, %v754_v38  ;;  %v761_v42 = vmul.f32 %v1139_v35, %v760_v39 }
 0x42c   :  { %v773_v48 = vmul.f32 %v758_v41, %v1585_v26  ;;  %v774_v33 = vmul.f32 %v758_v41, %v1587_v47  ;;  %v769_v47 = vmul.f32 %v738_v51, %v1565_v30 }
 0x42d   :  { %v762_v46 = vmul.f32 0.5, %v761_v42  ;;  %v818_v11 = vpop.permute.xlu1 %817 }
 0x42e   :  { %v806_v59 = vmul.f32 %v1561_v44, %v773_v48  ;;  %v807_v60 = vmul.f32 %v1561_v44, %v774_v33  ;;  %v802_v30 = vmul.f32 %v1614_v7, %v769_v47  ;;  %v836_v17 = vadd.f32 %v818_v11, %v803_v58 }
 0x42f   :  { %v763_v49 = vsub.f32 1.5, %v762_v46 }
 0x430   :  { %v790_v55 = vpop.permute.xlu0 %789  ;;  %v839_v37 = vadd.f32 %v1616_v5, %v806_v59  ;;  %v840_v25 = vadd.f32 %v1616_v5, %v807_v60  ;;  %v835_v15 = vadd.f32 %v818_v11, %v802_v30  ;;  %v844_v23 = vmax.f32 %v836_v17, 0.0 }
 0x431   :  { %v764_v54 = vmul.f32 %v1139_v35, %v763_v49  ;;  %v804_v4 = vmul.f32 %v790_v55, %v771_v61  ;;  %v805_v6 = vmul.f32 %v790_v55, %v772_v0  ;;  %v935_v0 = vlaneseq }
 0x432   :  { %v847_v18 = vmax.f32 %v839_v37, 0.0  ;;  %v848_v19 = vmax.f32 %v840_v25, 0.0  ;;  %v843_v63 = vmax.f32 %v835_v15, 0.0 }
 0x433   :  { %v768_v26 = vsel %vm767_vm13, %v1139_v35, %v764_v54  ;;  %v837_v13 = vadd.f32 %v823_v12, %v804_v4  ;;  %vm937_vm7 = vcmp.lt.s32.totalorder %v935_v0, 256 }
 0x434   :  { %v775_v2 = vmul.f32 %v768_v26, %v1595_v56  ;;  %v776_v3 = vmul.f32 %v768_v26, %v1597_v57  ;;  %v838_v56 = vadd.f32 %v823_v12, %v805_v6 }
 0x435   :  { %v845_v21 = vmax.f32 %v837_v13, 0.0 }
 0x436   :  { %v808_v8 = vmul.f32 %v1563_v29, %v775_v2  ;;  %v809_v44 = vmul.f32 %v1563_v29, %v776_v3  ;;  %v846_v22 = vmax.f32 %v838_v56, 0.0 }
 0x437   :  { %v852_v7 = vpack.c.bf16 %v845_v21, %v843_v63 }
 0x438   :  { %v841_v57 = vadd.f32 %v1618_v16, %v808_v8  ;;  %v842_v14 = vadd.f32 %v1618_v16, %v809_v44  ;;  %v853_v24 = vpack.c.bf16 %v846_v22, %v844_v23  ;;  %v851_v16 = vld [vmem:[%s1661_s8] sm:$0x1]  ;;  %v860_v27 = vpop.permute.xlu0 %859  ;;  %s1176_s8 = smov [#allocation3]  }
 0x439   :  { %v862_v28 = vperm.slane %v860_v27, 0  ;;  %s945_s12 = sshll.u32 %s1176_s8, 4  ;;  %s946_s12 = int_to_ptr.vmem [resolvable:$true] %s945_s12 }
 0x43a   :  { %v849_v29 = vmax.f32 %v841_v57, 0.0  ;;  %v850_v20 = vmax.f32 %v842_v14, 0.0 }
 0x43c   :  { %v854_v5 = vpack.c.bf16 %v849_v29, %v847_v18  ;;  %v855_v62 = vpack.c.bf16 %v850_v20, %v848_v19 }
 0x43e   :  { %872 = vmatpush.bf16.msra.mxu1 %v854_v5  ;;  %885 = vmatpush.bf16.msra.mxu3 %v855_v62 }
 0x442   :  { %873 = vmatpush.bf16.msra.mxu1 %v852_v7  ;;  %886 = vmatpush.bf16.msra.mxu3 %v853_v24 }
 0x445   :  { %1088 = vmatmul.msk.bf16.vlgmr.msra.gmra.mxu1 %vm335_vm3, %v851_v16  ;;  %1089 = vmatmul.msk.bf16.vlgmr.msra.gmra.mxu3 %vm335_vm3, %v851_v16 }
 0x4c2   :  { %v875_v43 = vpop.f32.mrf.mxu1 }
 0x4c3   :  { %v876_v52 = vadd.f32 %v875_v43, %v862_v28 }
 0x4c5   :  { %v1090_v53 = vmul.f32 -1.442695, %v876_v52 }
 0x4c7   :  { %1140 = vpow2.f32 %v1090_v53 }
 0x4c8   :  { %v888_v31 = vpop.f32.mrf.mxu3 }
 0x4c9   :  { %v889_v32 = vadd.f32 %v888_v31, %v862_v28 }
 0x4ca   :  { %v877_v34 = vpop.f32.mrf.mxu1 }
 0x4cb   :  { %v1091_v9 = vmul.f32 -1.442695, %v889_v32 }
 0x4cd   :  { %v1141_v10 = vpop.eup %1140  ;;  %1142 = vpow2.f32 %v1091_v9 }
 0x4ce   :  { %v898_v35 = vadd.f32 1.0, %v1141_v10 }
 0x4d0   :  { %1144 = vrcp.f32 %v898_v35  ;;  %v890_v36 = vpop.f32.mrf.mxu3  ;;  %vm905_vm15 = vweird.f32 %v898_v35  ;;  %v911_v55 = vand.u32 2147483648, %v898_v35  ;;  %v909_v60 = vand.u32 2147483647, %v898_v35 }
 0x4d2   :  { %v912_v2 = vor.u32 1.1754944e-38, %v911_v55  ;;  %vm910_vm6 = vcmp.eq.f32.partialorder %v909_v60, 8.507059e+37 }
 0x4d3   :  { %v1143_v38 = vpop.eup %1142 }
 0x4d4   :  { %v899_v39 = vadd.f32 1.0, %v1143_v38 }
 0x4d6   :  { %v1145_v41 = vpop.eup %1144  ;;  %1146 = vrcp.f32 %v899_v39  ;;  %v926_v49 = vand.u32 2147483648, %v899_v39  ;;  %v924_v54 = vand.u32 2147483647, %v899_v39  ;;  %vm920_vm2 = vweird.f32 %v899_v39 }
 0x4d7   :  { %v901_v42 = vmul.f32 %v1145_v41, %v898_v35  ;;  %vm906_vm3 = vweird.f32 %v1145_v41 }
 0x4d8   :  { %vm1643_vm1 = vmor %vm905_vm15, %vm906_vm3  ;;  %v927_v26 = vor.u32 1.1754944e-38, %v926_v49  ;;  %vm925_vm5 = vcmp.eq.f32.partialorder %v924_v54, 8.507059e+37 }
 0x4d9   :  { %v902_v45 = vsub.f32 1.0, %v901_v42 }
 0x4db   :  { %v903_v48 = vmul.f32 %v1145_v41, %v902_v45 }
 0x4dc   :  { %v1147_v40 = vpop.eup %1146 }
 0x4dd   :  { %v916_v46 = vmul.f32 %v1147_v40, %v899_v39  ;;  %v904_v50 = vadd.f32 %v1145_v41, %v903_v48  ;;  %vm921_vm14 = vweird.f32 %v1147_v40 }
 0x4de   :  { %vm922_vm4 = vmor %vm920_vm2, %vm921_vm14 }
 0x4df   :  { %v917_v33 = vsub.f32 1.0, %v916_v46  ;;  %v908_v47 = vsel %vm1643_vm1, %v1145_v41, %v904_v50 }
 0x4e0   :  { %v913_v6 = vsel %vm910_vm6, %v912_v2, %v908_v47 }
 0x4e1   :  { %v918_v51 = vmul.f32 %v1147_v40, %v917_v33 }
 0x4e3   :  { %v919_v61 = vadd.f32 %v1147_v40, %v918_v51 }
 0x4e5   :  { %v923_v1 = vsel %vm922_vm4, %v1147_v40, %v919_v61 }
 0x4e6   :  { %v928_v3 = vsel %vm925_vm5, %v927_v26, %v923_v1 }
 0x4e7   :  { %v932_v4 = vrot.slane %v928_v3, 7 }
 0x4e9   :  { %v933_v8 = vsel %vm206_vm0, %v913_v6, %v932_v4 }
 0x4ea   :  { %939 = vst.msk [vmem:[#allocation3] sm:$0x3] %vm937_vm7, %v933_v8 }
 0x4eb   :  { %950 = dma.vmem_to_hbm [thread:$0]  %s946_s12, 32, %s948_s14, [#allocation4]  }
 0x4ec   :  { %1172 = dma.done.wait [#allocation4], 32  }
 0x4ed   :  { %1173 = vsyncadd [#allocation4], 4294967264 }
 0x4ee   :  { %955 = vsyncpa [#allocation4], 1 }

</bundles_post_ra>
